<compile_context>
chip_gen: v5e
topology: v5e:2x2
jax: 0.10.0
libtpu: 0.0.40
codegen_flags: <defaults>
</compile_context>

<pallas_src>
import numpy as np
import jax
import jax.numpy as jnp
from jax.experimental import pallas as pl
from jax.experimental.pallas import tpu as pltpu


# ----------------------------------------------------------------------------
# Parameter / buffer construction (mirrors LaplacianLoss.__init__ exactly).
# ----------------------------------------------------------------------------
def build_laplacian(nv: int, faces: np.ndarray) -> np.ndarray:
    lap = np.zeros([nv, nv], dtype=np.float32)
    lap[faces[:, 0], faces[:, 1]] = -1
    lap[faces[:, 1], faces[:, 0]] = -1
    lap[faces[:, 1], faces[:, 2]] = -1
    lap[faces[:, 2], faces[:, 1]] = -1
    lap[faces[:, 2], faces[:, 0]] = -1
    lap[faces[:, 0], faces[:, 2]] = -1
    r, c = np.diag_indices(lap.shape[0])
    lap[r, c] = -lap.sum(1)
    for i in range(nv):
        if lap[i, i] != 0:
            lap[i, :] /= lap[i, i]
    return lap


def _round_up(x: int, m: int) -> int:
    return (x + m - 1) // m * m


# ----------------------------------------------------------------------------
# Pallas kernel.
#   Grid = (num_col_tiles [parallel], num_row_tiles [arbitrary/reduce]).
#   lap_ref : (TM, NV_pad)  row slab of L          (changes with i)
#   x_ref   : (NV_pad, TN)  lane tile of X=(NV,BD) (changes with j)
#   o_ref   : (1, TN)       per-column sum of (L @ X)^2, resident over i
# ----------------------------------------------------------------------------
def laplacian_loss_kernel(lap_ref, x_ref, o_ref):
    @pl.when(pl.program_id(1) == 0)
    def _():
        o_ref[...] = jnp.zeros_like(o_ref)

    # MXU matmul: (TM, NV_pad) @ (NV_pad, TN) -> (TM, TN), f32 accumulation.
    y = jnp.dot(lap_ref[...], x_ref[...], preferred_element_type=jnp.float32)
    # Partial reduce over this row slab; accumulate into the resident output.
    o_ref[...] += jnp.sum(y * y, axis=0, keepdims=True)


# ----------------------------------------------------------------------------
# Wrapper: layout plumbing (transpose/reshape/pad) + pallas_call + final
# group-of-D reduce to per-batch scalars.
# ----------------------------------------------------------------------------
def laplacian_loss(laplacian: jax.Array, x: jax.Array, average: bool = False,
                   *, tm: int | None = None):
    B, NV, D = x.shape
    assert laplacian.shape == (NV, NV)

    BD = B * D
    BD_pad = _round_up(BD, 128)                 # lane-dense RHS width
    TN = BD_pad if BD_pad <= 512 else 128       # lane tile (divides BD_pad)

    # Row-tile size for L: multiple of 8, sized for v7x's smaller VMEM.
    if tm is None:
        tm = 256
    tm = _round_up(min(tm, _round_up(NV, 8)), 8)
    NV_pad = _round_up(NV, tm)

    # Lane-dense RHS: X[:, b*D + d] = x[b, :, d]; zero padding is inert
    # (padded rows/cols of L and X contribute exactly 0 to the sums).
    x2 = jnp.transpose(x, (1, 0, 2)).reshape(NV, BD).astype(jnp.float32)
    x2 = jnp.pad(x2, ((0, NV_pad - NV), (0, BD_pad - BD)))
    lap = jnp.pad(laplacian.astype(jnp.float32),
                  ((0, NV_pad - NV), (0, NV_pad - NV)))

    grid = (BD_pad // TN, NV_pad // tm)

    col_sums = pl.pallas_call(
        laplacian_loss_kernel,
        out_shape=jax.ShapeDtypeStruct((1, BD_pad), jnp.float32),
        grid=grid,
        in_specs=[
            # L: row slab i, full K in lanes (last dim == full array dim).
            pl.BlockSpec((tm, NV_pad), lambda j, i: (i, 0)),
            # X: lane tile j, full K in sublanes; constant across i.
            pl.BlockSpec((NV_pad, TN), lambda j, i: (0, j)),
        ],
        # Lane-dense output block, resident across the row-reduction axis.
        out_specs=pl.BlockSpec((1, TN), lambda j, i: (0, j)),
        compiler_params=pltpu.CompilerParams(
            dimension_semantics=("parallel", "arbitrary"),
            vmem_limit_bytes=32 * 1024 * 1024,
        ),
    )(lap, x2)

    # Tiny final reduce: group every D consecutive columns into one batch sum.
    per_batch = col_sums[0, :BD].reshape(B, D).sum(axis=-1)

    if average:
        return jnp.sum(per_batch) / B
    return per_batch


# ----------------------------------------------------------------------------
# Demo / self-check
# ----------------------------------------------------------------------------
if __name__ == "__main__":
    B, NV, D = 2, 96, 3
    NF = 144

    # Deterministic synthetic mesh connectivity (valid triangle indices).
    faces = np.stack(
        [np.arange(NF) % NV,
         (np.arange(NF) + 1) % NV,
         (np.arange(NF) + 7) % NV],
        axis=1,
    ).astype(np.int64)

    lap_np = build_laplacian(NV, faces)
    laplacian = jnp.asarray(lap_np)

    key = jax.random.PRNGKey(0)
    x = jax.random.normal(key, (B, NV, D), dtype=jnp.float32)

    # Pure-JAX reference (same math as the PyTorch forward).
    ref = jnp.sum(jnp.einsum("vw,bwd->bvd", laplacian, x) ** 2, axis=(1, 2))

    # Small tm forces multiple row-tiles so the accumulation path is exercised.
    out = laplacian_loss(laplacian, x, average=False, tm=32)
    out = jax.block_until_ready(out)
    assert out.shape == (B,)
    assert jnp.allclose(out, ref, rtol=1e-4, atol=1e-4)

    # Default tiling + average=True path.
    out_avg = laplacian_loss(laplacian, x, average=True)
    out_avg = jax.block_until_ready(out_avg)
    ref_avg = jnp.sum(ref) / B
    assert jnp.allclose(out_avg, ref_avg, rtol=1e-4, atol=1e-4)

    print("KERNEL_OK")
</pallas_src>

<mosaic_0001>
module attributes {stable_mosaic.version = 11 : i64} {
  func.func @laplacian_loss_kernel(%arg0: i32, %arg1: i32, %arg2: memref<32x96xf32, #tpu.memory_space<vmem>>, %arg3: memref<96x128xf32, #tpu.memory_space<vmem>>, %arg4: memref<1x128xf32, #tpu.memory_space<vmem>>) attributes {dimension_semantics = [#tpu.dimension_semantics<parallel>, #tpu.dimension_semantics<arbitrary>], iteration_bounds = array<i64: 1, 3>, scalar_prefetch = 0 : i64, scratch_operands = 0 : i64, tpu.core_type = #tpu.core_type<tc>, window_params = [{transform_indices = @transform_0, window_bounds = array<i64: 32, 96>}, {transform_indices = @transform_1, window_bounds = array<i64: 96, 128>}, {transform_indices = @transform_2, window_bounds = array<i64: 1, 128>}]} {
    %c0_i32 = arith.constant 0 : i32
    %0 = arith.cmpi eq, %arg1, %c0_i32 : i32
    %1 = arith.extui %0 : i1 to i32
    %c0_i32_0 = arith.constant 0 : i32
    %2 = arith.cmpi ne, %1, %c0_i32_0 : i32
    scf.if %2 {
      %cst_9 = arith.constant 0.000000e+00 : f32
      %12 = vector.broadcast %cst_9 : f32 to vector<1x128xf32>
      %c0_10 = arith.constant 0 : index
      %c0_11 = arith.constant 0 : index
      %13 = vector.load %arg4[%c0_10, %c0_11] : memref<1x128xf32, #tpu.memory_space<vmem>>, vector<1x128xf32>
      tpu.vector_store %arg4[%c0_10, %c0_11], %12 {strides = array<i32>} : memref<1x128xf32, #tpu.memory_space<vmem>>, vector<1x128xf32>,
    } else {
    }
    %c0 = arith.constant 0 : index
    %c0_1 = arith.constant 0 : index
    %3 = vector.load %arg2[%c0, %c0_1] : memref<32x96xf32, #tpu.memory_space<vmem>>, vector<32x96xf32>
    %c0_2 = arith.constant 0 : index
    %c0_3 = arith.constant 0 : index
    %4 = vector.load %arg3[%c0_2, %c0_3] : memref<96x128xf32, #tpu.memory_space<vmem>>, vector<96x128xf32>
    %cst = arith.constant dense<0.000000e+00> : vector<32x128xf32>
    %5 = tpu.matmul %3, %4, %cst {dimension_numbers = #tpu.dot_dimension_numbers<[1], [0], [0], [1], [0, 0, 1, 1], [], []>} : vector<32x96xf32>, vector<96x128xf32>, vector<32x128xf32> -> vector<32x128xf32>
    %c0_4 = arith.constant 0 : index
    %c0_5 = arith.constant 0 : index
    %6 = vector.load %arg4[%c0_4, %c0_5] : memref<1x128xf32, #tpu.memory_space<vmem>>, vector<1x128xf32>
    %7 = arith.mulf %5, %5 : vector<32x128xf32>
    %cst_6 = arith.constant dense<0.000000e+00> : vector<128xf32>
    %8 = vector.multi_reduction <add>, %7, %cst_6 [0] : vector<32x128xf32> to vector<128xf32>
    %9 = vector.shape_cast %8 : vector<128xf32> to vector<1x128xf32>
    %10 = arith.addf %6, %9 : vector<1x128xf32>
    %c0_7 = arith.constant 0 : index
    %c0_8 = arith.constant 0 : index
    %11 = vector.load %arg4[%c0_7, %c0_8] : memref<1x128xf32, #tpu.memory_space<vmem>>, vector<1x128xf32>
    tpu.vector_store %arg4[%c0_7, %c0_8], %10 {strides = array<i32>} : memref<1x128xf32, #tpu.memory_space<vmem>>, vector<1x128xf32>,
    return
  }
  func.func @transform_0(%arg0: i32, %arg1: i32) -> (i32, i32) {
    %c0_i32 = arith.constant 0 : i32
    %c0_i32_0 = arith.constant 0 : i32
    return %arg1, %c0_i32 : i32, i32
  }
  func.func @transform_1(%arg0: i32, %arg1: i32) -> (i32, i32) {
    %c0_i32 = arith.constant 0 : i32
    %c0_i32_0 = arith.constant 0 : i32
    return %c0_i32, %arg0 : i32, i32
  }
  func.func @transform_2(%arg0: i32, %arg1: i32) -> (i32, i32) {
    %c0_i32 = arith.constant 0 : i32
    %c0_i32_0 = arith.constant 0 : i32
    return %c0_i32, %arg0 : i32, i32
  }
}

</mosaic_0001>

<bundles_post_ra>
// kernel: tpu_custom_call.1
= control target key start
LH: loop header
LB: loop body
LE: loop exit
PB: predicated region body
PF: predicated region fallthrough
CT: control target
= control target key end

     0   :  { %7 = vsyncpa [#allocation3], 0  ;;  %s775_s0 = inlined_call_operand.hbm [shape: f32[96,96], index: 0, kind: input, shape index: {}]   ;;  %s776_s1 = inlined_call_operand.hbm [shape: f32[96,128], index: 1, kind: input, shape index: {}]   ;;  %s777_s2 = inlined_call_operand.hbm [shape: f32[1,128], index: 2, kind: output, shape index: {}]  }
   0x1   :  { %9 = vsyncpa [#allocation3 + $0x1], 0 }
   0x2   :  { %10 = vsyncpa [#allocation6], 0 }
   0x3   :  { %11 = vsyncpa [#allocation4], 0  ;;  %s655_s9 = smov 0   ;;  %s657_s10 = smov 0  }
   0x4   :  { %s659_s11 = smov 0   ;;  %s661_s12 = smov 0  }
   0x5   :  { %s663_s13 = smov 0   ;;  %s665_s14 = smov 0  }
   0x6 LB: > { %s355_s15 = sadd.s32 4294967295, %s633_s14   ;;  %p49_p0 = scmp.ne.s32.totalorder %s617_s10, %s613_s9  ;;  %s633_s14 = sphi %s665_s14, %s17_s14   ;;  %s629_s13 = sphi %s663_s13, %s786_s13   ;;  %s625_s12 = sphi %s661_s12, %s785_s12   ;;  %s621_s11 = sphi %s659_s11, %s784_s11   ;;  %s617_s10 = sphi %s657_s10, %s783_s10   ;;  %s613_s9 = sphi %s655_s9, %s782_s9  }
   0x7   : > { %p687_p1 = scmp.eq.s32.totalorder %s355_s15, 0  ;;  %p356_p2 = scmp.ge.s32.totalorder %s633_s14, 1 }
   0x8   : > { %p112_p3 = scmp.lt.s32.totalorder %s633_s14, 4  ;;  %s125_s20 = sshll.u32 %s776_s1, 4  ;;  %s126_s20 = int_to_ptr.hbm [resolvable:$true] %s125_s20 }
   0x9   : > { %p695_p4 = por %p687_p1, %p49_p0  ;;  %s635_s22 = smov [#allocation5]  }
   0xa   : > { %p702_p5 = pnand %p356_p2, %p112_p3  ;;  %s127_s23 = sshll.u32 %s635_s22, 4  ;;  %s128_s23 = int_to_ptr.vmem [resolvable:$true] %s127_s23 }
   0xb   : > { %s636_s24 = smov 128   ;;  %s637_s25 = smov 8  }
   0xc   : > { %p421_p6 = pneg %p702_p5  ;;  %s26_s26 = sadd.s32 1, %s629_s13 }
   0xd   : > { %p27_p8 = scmp.ge.s32.totalorder %s26_s26, 3  ;;  %p43_p9 = scmp.ne.s32.totalorder %s621_s11, %s617_s10 }
   0xe   : > { %p422_p7 = pnand %p421_p6, %p687_p1  ;;  %p44_p10 = scmp.eq.s32.totalorder %s633_s14, 0 }
   0xf   : > { %s788_s26 = smov (%p27_p8, %s26_s26), 0  ;;  %s36_s27 = sadd.s32 1, %s621_s11 }
  0x10   : > { %424 = dma.hbm_to_vmem [thread:$0]  (!%p422_p7), %s126_s20, 1536, %s128_s23, [#allocation6], %s636_s24, %s636_s24, %s637_s25  }
  0x11   : > { %p717_p11 = por %p44_p10, %p43_p9  ;;  %s33_s29 = ssub.s32 %s629_s13, %s788_s26 }
  0x12   : > { %s141_s30 = sand.u32 1, %s621_s11   ;;  %p34_p12 = scmp.eq.s32.totalorder %s33_s29, 0 }
  0x13   : > { %p430_p13 = scmp.lt.s32.totalorder %s633_s14, 3  ;;  %s359_s3 = sshll.u32 %s141_s30, 5 }
  0x14   : > { %s374_s4 = sshll.u32 %s629_s13, 5  ;;  %s145_s18 = scalar_lea.vmem [#allocation2], %s359_s3 }
  0x15   : > { %s727_s5 = scalar_select %p34_p12, %s621_s11, %s36_s27  }
  0x16   : > { %s150_s8 = scalar_lea.hbm %s775_s0, %s374_s4  ;;  %s153_s19 = sshll.u32 %s145_s18, 4  ;;  %s154_s19 = int_to_ptr.vmem [resolvable:$true] %s153_s19 }
  0x17   : > { %s151_s9 = sshll.u32 %s150_s8, 4  ;;  %p426_p0 = pnand %p430_p13, %p717_p11  ;;  %s152_s9 = int_to_ptr.hbm [resolvable:$true] %s151_s9 }
  0x18   : > { %s142_s20 = scalar_lea.sflag [#allocation3], %s141_s30  ;;  %165 = sbr.rel (%p702_p5) target bundleno = 221 (0xdd), region = 28 }
  0x19   : > { %428 = dma.hbm_to_vmem [thread:$0]  (!%p426_p0), %s152_s9, 512, %s154_s19, %s142_s20, %s636_s24, %s636_s24, %s637_s25  }
  0x1a   : > { %s167_s22 = sand.u32 (!%p702_p5), 1, %s617_s10  }
  0x1b   : > { %s363_s23 = sshll.u32 (!%p702_p5), %s167_s22, 5  ;;  %s168_s27 = scalar_lea.sflag (!%p702_p5), [#allocation3], %s167_s22 }
  0x1c   : > { %s737_s29 = scalar_lea.vmem (!%p702_p5), [#allocation2], %s363_s23 }
  0x1d   : > { %600 = dma.done.wait (%p695_p4), %s168_s27, 512  }
  0x1e   : > { %602 = vsyncadd (%p695_p4), %s168_s27, 4294966784 }
  0x1f   : > { %604 = dma.done.wait (%p687_p1), [#allocation6], 1536  }
  0x20   : > { %606 = vsyncadd (%p687_p1), [#allocation6], 4294965760  ;;  %p365_p2 = scmp.ne.s32.totalorder %s625_s12, 0 }
  0x22   : > { %197 = sbr.rel (%p365_p2) target bundleno = 41 (0x29), region = 40 }
  0x27   : > { %v638_v0 = vmov 0.0  }
  0x28   : > { %198 = vst [vmem:[#allocation7] sm:$0x1] %v638_v0 }
  0x29 PF: > { %v214_v1 = vld [vmem:[#allocation5 + $0x58] sm:$0xff]  ;;  %v213_v2 = vld [vmem:[#allocation5 + $0x50] sm:$0xff]  ;;  %v212_v3 = vld [vmem:[#allocation5 + $0x48] sm:$0xff]  ;;  %vm215_vm0 = vcmask 785408   ;;  %s639_s12 = smov [#allocation7]   ;;  %s282_s24 = sshll.u32 %s777_s2, 4  ;;  %s283_s24 = int_to_ptr.hbm [resolvable:$true] %s282_s24 }
  0x2a   : > { %376 = vmatpush.msra.mxu2 %v214_v1  ;;  %377 = vmatpush.msra.mxu3 %v214_v1  ;;  %v211_v4 = vld [vmem:[#allocation5 + $0x40] sm:$0xff]  ;;  %v210_v5 = vld [vmem:[#allocation5 + $0x38] sm:$0xff]  ;;  %v209_v6 = vld [vmem:[#allocation5 + $0x30] sm:$0xff]  ;;  %s280_s16 = sshll.u32 %s639_s12, 4  ;;  %p432_p1 = scmp.eq.s32.totalorder %s355_s15, 2  ;;  %s281_s16 = int_to_ptr.vmem [resolvable:$true] %s280_s16 }
  0x2b   : > { %232 = vmatpush.msra.mxu0 %v214_v1  ;;  %375 = vmatpush.msra.mxu1 %v214_v1  ;;  %v208_v7 = vld [vmem:[#allocation5 + $0x28] sm:$0xff]  ;;  %v207_v8 = vld [vmem:[#allocation5 + $0x20] sm:$0xff]  ;;  %v206_v9 = vld [vmem:[#allocation5 + $0x18] sm:$0xff] }
  0x2c   : > { %379 = vmatpush.msra.mxu2 %v213_v2  ;;  %380 = vmatpush.msra.mxu3 %v213_v2  ;;  %v205_v10 = vld [vmem:[#allocation5 + $0x10] sm:$0xff]  ;;  %v204_v11 = vld [vmem:[#allocation5 + $0x8] sm:$0xff]  ;;  %v203_v12 = vld [vmem:[#allocation5] sm:$0xff] }
  0x2d   : > { %233 = vmatpush.msra.mxu0 %v213_v2  ;;  %378 = vmatpush.msra.mxu1 %v213_v2  ;;  %v201_v13 = vld [vmem:[%s737_s29 + $0x10] sm:$0xff]  ;;  %v202_v14 = vld [vmem:[%s737_s29 + $0x18] sm:$0xff]  ;;  %v199_v15 = vld [vmem:[%s737_s29] sm:$0xff] }
  0x2e   : > { %382 = vmatpush.msra.mxu2 %v212_v3  ;;  %383 = vmatpush.msra.mxu3 %v212_v3  ;;  %v200_v16 = vld [vmem:[%s737_s29 + $0x8] sm:$0xff] }
  0x2f   : > { %234 = vmatpush.msra.mxu0 %v212_v3  ;;  %381 = vmatpush.msra.mxu1 %v212_v3  ;;  %v257_v33 = vld [vmem:[#allocation7] sm:$0x1] }
  0x30   : > { %385 = vmatpush.msra.mxu2 %v211_v4  ;;  %386 = vmatpush.msra.mxu3 %v211_v4 }
  0x31   : > { %235 = vmatpush.msra.mxu0 %v211_v4  ;;  %384 = vmatpush.msra.mxu1 %v211_v4 }
  0x32   : > { %388 = vmatpush.msra.mxu2 %v210_v5  ;;  %389 = vmatpush.msra.mxu3 %v210_v5 }
  0x33   : > { %236 = vmatpush.msra.mxu0 %v210_v5  ;;  %387 = vmatpush.msra.mxu1 %v210_v5 }
  0x34   : > { %391 = vmatpush.msra.mxu2 %v209_v6  ;;  %392 = vmatpush.msra.mxu3 %v209_v6 }
  0x35   : > { %237 = vmatpush.msra.mxu0 %v209_v6  ;;  %390 = vmatpush.msra.mxu1 %v209_v6 }
  0x36   : > { %394 = vmatpush.msra.mxu2 %v208_v7  ;;  %395 = vmatpush.msra.mxu3 %v208_v7 }
  0x37   : > { %238 = vmatpush.msra.mxu0 %v208_v7  ;;  %393 = vmatpush.msra.mxu1 %v208_v7 }
  0x38   : > { %397 = vmatpush.msra.mxu2 %v207_v8  ;;  %398 = vmatpush.msra.mxu3 %v207_v8 }
  0x39   : > { %239 = vmatpush.msra.mxu0 %v207_v8  ;;  %396 = vmatpush.msra.mxu1 %v207_v8 }
  0x3a   : > { %400 = vmatpush.msra.mxu2 %v206_v9  ;;  %401 = vmatpush.msra.mxu3 %v206_v9 }
  0x3b   : > { %240 = vmatpush.msra.mxu0 %v206_v9  ;;  %399 = vmatpush.msra.mxu1 %v206_v9 }
  0x3c   : > { %403 = vmatpush.msra.mxu2 %v205_v10  ;;  %404 = vmatpush.msra.mxu3 %v205_v10 }
  0x3d   : > { %241 = vmatpush.msra.mxu0 %v205_v10  ;;  %402 = vmatpush.msra.mxu1 %v205_v10 }
  0x3e   : > { %406 = vmatpush.msra.mxu2 %v204_v11  ;;  %407 = vmatpush.msra.mxu3 %v204_v11 }
  0x3f   : > { %242 = vmatpush.msra.mxu0 %v204_v11  ;;  %405 = vmatpush.msra.mxu1 %v204_v11 }
  0x40   : > { %409 = vmatpush.msra.mxu2 %v203_v12  ;;  %410 = vmatpush.msra.mxu3 %v203_v12 }
  0x41   : > { %368 = vmatmul.msk.f32.vlgmr.msra.gmra.mxu2 %vm215_vm0, %v201_v13  ;;  %369 = vmatmul.msk.f32.vlgmr.msra.gmra.mxu3 %vm215_vm0, %v202_v14 }
  0x42   : > { %243 = vmatpush.msra.mxu0 %v203_v12  ;;  %408 = vmatpush.msra.mxu1 %v203_v12 }
  0x43   : > { %366 = vmatmul.msk.f32.vlgmr.msra.gmra.mxu0 %vm215_vm0, %v199_v15  ;;  %367 = vmatmul.msk.f32.vlgmr.msra.gmra.mxu1 %vm215_vm0, %v200_v16 }
  0xc0   : > { %v245_v17 = vpop.f32.mrf.mxu0  ;;  %v248_v18 = vpop.f32.mrf.mxu1 }
  0xc1   : > { %v258_v19 = vmul.f32 %v245_v17, %v245_v17  ;;  %v259_v20 = vmul.f32 %v248_v18, %v248_v18 }
  0xc3   : > { %v262_v21 = vadd.f32 %v259_v20, %v258_v19 }
  0xc4   : > { %v251_v22 = vpop.f32.mrf.mxu2  ;;  %v254_v23 = vpop.f32.mrf.mxu3 }
  0xc5   : > { %v260_v24 = vmul.f32 %v251_v22, %v251_v22  ;;  %v261_v25 = vmul.f32 %v254_v23, %v254_v23 }
  0xc7   : > { %v263_v26 = vadd.f32 %v262_v21, %v260_v24 }
  0xc9   : > { %v264_v27 = vadd.f32 %v263_v26, %v261_v25 }
  0xcb   : > { %v265_v28 = vrot.slane %v264_v27, 4 }
  0xcd   : > { %v266_v29 = vadd.f32 %v265_v28, %v264_v27 }
  0xcf   : > { %v267_v30 = vrot.slane %v266_v29, 2 }
  0xd1   : > { %v268_v31 = vadd.f32 %v267_v30, %v266_v29 }
  0xd3   : > { %v269_v32 = vrot.slane %v268_v31, 1 }
  0xd5   : > { %v270_v34 = vadd.f32 %v269_v32, %v268_v31 }
  0xd7   : > { %v271_v35 = vadd.f32 %v270_v34, %v257_v33 }
  0xd9   : > { %272 = vst [vmem:[#allocation7] sm:$0x1] %v271_v35 }
  0xda   : > { %418 = dma.vmem_to_hbm [thread:$0]  (%p432_p1), %s281_s16, 16, %s283_s24, [#allocation4]  }
  0xdb   : > { %608 = dma.done.wait (%p432_p1), [#allocation4], 16  }
  0xdc   : > { %610 = vsyncadd (%p432_p1), [#allocation4], 4294967280 }
  0xdd PF: > { %s17_s14 = sadd.s32 1, %s633_s14   ;;  %s782_s9 = smov %s617_s10 }
  0xde   : > { %p14_p3 = scmp.ge.s32.totalorder %s17_s14, 5   ;;  %s783_s10 = smov %s621_s11 }
  0xdf   : > { %s784_s11 = smov %s727_s5  ;;  %s785_s12 = smov %s629_s13 }
  0xe0   : > { %s786_s13 = smov %s788_s26  ;;  %16 = sbr.rel (!%p14_p3) target bundleno = 6 (0x6), region = 75 }
  0xe5   :  { %296 = vsyncpa [#allocation3], 1 }
  0xe6   :  { %298 = vsyncpa [#allocation3 + $0x1], 1 }
  0xe7   :  { %299 = vsyncpa [#allocation6], 1 }
  0xe8   :  { %300 = vsyncpa [#allocation4], 1 }
  0xe9   :  { %302 = vsyncpa [#allocation4 + $0x1], 1 }

</bundles_post_ra>
